<compile_context>
chip_gen: v5e
topology: v5e:2x2
jax: 0.10.0
libtpu: 0.0.40
codegen_flags: <defaults>
</compile_context>

<pallas_src>
import functools
import math

import jax
import jax.numpy as jnp
import numpy as np
from jax.experimental import pallas as pl
from jax.experimental.pallas import tpu as pltpu


def _round_up(a: int, b: int) -> int:
    return ((a + b - 1) // b) * b


def _dct_matrix(n: int) -> np.ndarray:
    """Orthonormal DCT-II matrix (rows = frequencies)."""
    k = np.arange(n)[:, None].astype(np.float64)
    m = np.arange(n)[None, :].astype(np.float64)
    mat = np.sqrt(2.0 / n) * np.cos(np.pi * (m + 0.5) * k / n)
    mat[0, :] *= 1.0 / np.sqrt(2.0)
    return mat.astype(np.float32)


def _vmem_info():
    """(scoped vmem limit to request, physical VMEM capacity) in bytes."""
    cap = 64 * 1024 * 1024                      # conservative: v7x per-TC
    try:
        info = pltpu.get_tpu_info()
        for name in ("vmem_capacity_bytes", "vmem_bytes", "vmem_size_bytes"):
            v = getattr(info, name, None)
            if v:
                cap = int(v)
                break
    except Exception:
        pass
    limit = min(96 * 1024 * 1024, (cap * 3) // 4)   # 96 MiB on 128 MiB parts,
    return max(limit, 32 * 1024 * 1024), cap        # 48 MiB on 64 MiB parts


def _choose_block_batch(batch, cin, cout, nx, kp_pad, modes_pad, *, cdt_size,
                        out_size, w_bytes, const_misc_bytes, vmem_limit_bytes,
                        target_m_rows):
    """Batch elements folded into one grid step (always a multiple of 8)."""
    align = 8
    # Honest per-batch-element VMEM per grid step: double-buffered in/out
    # blocks + the f32/compute-dtype intermediates (bp, accumulators, y).
    per_b = (2 * cin * nx * cdt_size             # input block   x2 buffers
             + 2 * cout * nx * out_size          # output block  x2 buffers
             + cin * kp_pad * (4 + cdt_size)     # forward-transform output
             + cout * modes_pad * 4              # accumulators
             + 2 * nx * 4)                       # inverse-transform temporaries
    # Constant operands are double-buffered by the pipeline even though their
    # block index never changes.
    const = 2 * (w_bytes + const_misc_bytes)
    budget = vmem_limit_bytes - const - (4 << 20)          # pipelining headroom
    cap = max(align, (budget // max(per_b, 1)) // align * align)

    bb = _round_up(max(1, target_m_rows // max(cin, 1)), align)
    bb = min(bb, cap)
    # Keep >= 2 grid steps (v7x: shards the "parallel" axis across both
    # TensorCores) as long as each step still feeds the MXU a tall LHS.
    half = _round_up((batch + 1) // 2, align)
    if cin * half >= 256:
        bb = min(bb, half)
    bb = min(bb, _round_up(batch, align))
    return max(bb, align)


def _pseudo_spectra_kernel(u_ref, tfwd_ref, tinv_ref, w_ref, out_ref, *,
                           modes, bandwidth, cin, cout, modes_pad,
                           use_mxu_band):
    # u_ref:    (Cin, bb, Nx)   channel-major input block, bb % 8 == 0
    # tfwd_ref: (Nx, kp_pad)    sliced forward transform; triL pad and lane
    #                           padding are zero columns
    # tinv_ref: (modes, Nx)     first `modes` rows of the inverse transform
    # w_ref:    MXU path: (Cin, kp_pad, Cout*modes_pad) block-banded weights
    #           VPU path: (bandwidth*Cin*Cout, modes) f32 per-mode weights
    # out_ref:  (Cout, bb, Nx)  channel-major output block
    _, bb, nx = u_ref.shape
    tfwd = tfwd_ref[...]
    tinv = tinv_ref[...]
    # Free reshape: bb % 8 == 0 so no (8,128) tile is crossed.
    u2 = u_ref[...].reshape(cin * bb, nx)

    if use_mxu_band:
        # ---- forward transform (one tall MXU matmul) ----
        bp = jnp.dot(u2, tfwd, preferred_element_type=tfwd.dtype)  # (cin*bb, kp_pad)
        # ---- banded contraction on the MXU (block-banded weight matrix) ----
        acc = jnp.zeros((bb, cout * modes_pad), jnp.float32)
        for i in range(cin):
            acc = acc + jnp.dot(bp[i * bb:(i + 1) * bb, :], w_ref[i],
                                preferred_element_type=jnp.float32)
        # ---- inverse transform, per output channel (128-aligned col starts) --
        for o in range(cout):
            blk = acc[:, o * modes_pad:o * modes_pad + modes].astype(tinv.dtype)
            y = jnp.dot(blk, tinv, preferred_element_type=jnp.float32)
            out_ref[o] = y.astype(out_ref.dtype)
    else:
        # ---- forward transform ----
        bp = jnp.dot(u2, tfwd, preferred_element_type=jnp.float32)
        w_all = w_ref[...]                         # (bw*cin*cout, modes) f32
        # Dense (bb, modes) accumulator per output channel (no tiny channel
        # dims on sublanes, no reshape before the inverse matmul).
        accs = [jnp.zeros((bb, modes), jnp.float32) for _ in range(cout)]
        for i in range(cin):
            bp_i = bp[i * bb:(i + 1) * bb, :]      # 8-aligned sublane slice
            for wi in range(bandwidth):
                seg = bp_i[:, wi:wi + modes]       # shifted once, reused over o
                for o in range(cout):
                    r = (wi * cin + i) * cout + o
                    accs[o] = accs[o] + seg * w_all[r:r + 1, :]
        for o in range(cout):
            y = jnp.dot(accs[o].astype(tinv.dtype), tinv,
                        preferred_element_type=jnp.float32)
            out_ref[o] = y.astype(out_ref.dtype)


def pseudo_spectra_1d(u, weights, tmat, *, modes, bandwidth, triL,
                      block_batch=None, compute_dtype=jnp.bfloat16,
                      contraction="auto"):
    """u: (B, Cin, Nx); weights: (modes, Cin, Cout, bandwidth); tmat: (Nx, Nx)."""
    B, Cin, Nx = u.shape
    modes_w, cin_w, Cout, bw = weights.shape
    assert modes_w == modes and cin_w == Cin and bw == bandwidth
    assert modes <= Nx
    assert modes + bandwidth - 1 <= Nx + triL

    out_dtype = u.dtype
    cdt = np.dtype(compute_dtype)
    out_size = np.dtype(out_dtype).itemsize

    # ---- pre-pack transform matrices (wrapper-side, trace-time only) ----
    kp = modes + bandwidth - 1            # spectral coefficients consumed
    kp_pad = _round_up(kp, 128)           # lane-dense MXU output
    kcols = kp - triL                     # real (non-padded) coefficients
    assert 0 <= kcols <= Nx
    modes_pad = _round_up(modes, 128)

    tfwd = jnp.zeros((Nx, kp_pad), jnp.float32)
    tfwd = tfwd.at[:, triL:kp].set(tmat[:kcols, :].T)   # fold triL pad + slice
    tfwd = tfwd.astype(compute_dtype)
    tinv = tmat[:modes, :].astype(compute_dtype)        # only first `modes` rows

    # ---- choose contraction path & pack weights ----
    wmat_bytes = Cin * kp_pad * Cout * modes_pad * cdt.itemsize
    if contraction == "auto":
        use_mxu = wmat_bytes <= 4 * 1024 * 1024
    else:
        use_mxu = contraction == "mxu"

    if use_mxu:
        # Block-banded matrix per input channel:
        #   wmat[i, m+w, o*modes_pad + m] = weights[m, i, o, w]
        wmat4 = jnp.zeros((Cin, kp_pad, Cout, modes_pad), jnp.float32)
        m_idx = jnp.arange(modes)
        for w in range(bandwidth):
            wmat4 = wmat4.at[:, m_idx + w, :, m_idx].set(weights[:, :, :, w])
        w_packed = wmat4.reshape(Cin, kp_pad, Cout * modes_pad).astype(compute_dtype)
    else:
        # (bandwidth, Cin, Cout, modes) flattened to rows; f32 for the VPU.
        w_packed = jnp.transpose(weights, (3, 1, 2, 0)).reshape(
            bandwidth * Cin * Cout, modes).astype(jnp.float32)
    w_bytes = int(np.prod(w_packed.shape)) * np.dtype(w_packed.dtype).itemsize

    # ---- generation-aware batch blocking ----
    vmem_limit, vmem_cap = _vmem_info()
    target_m = 1024 if vmem_cap >= 100 * 1024 * 1024 else 512
    const_misc = (Nx * kp_pad + modes * Nx) * cdt.itemsize
    if block_batch is None:
        bb = _choose_block_batch(B, Cin, Cout, Nx, kp_pad, modes_pad,
                                 cdt_size=cdt.itemsize, out_size=out_size,
                                 w_bytes=w_bytes, const_misc_bytes=const_misc,
                                 vmem_limit_bytes=vmem_limit,
                                 target_m_rows=target_m)
    else:
        bb = _round_up(block_batch, 8)    # bb must stay sublane aligned
    b_pad = _round_up(B, bb)
    grid_steps = b_pad // bb

    # Channel-major input (Cin, b_pad, Nx); the transpose/pad/cast is a single
    # fused XLA pass on HBM, replacing a per-grid-step relayout in VMEM.
    u3 = jnp.transpose(u, (1, 0, 2)).astype(compute_dtype)
    if b_pad != B:
        u3 = jnp.pad(u3, ((0, 0), (0, b_pad - B), (0, 0)))

    kernel = functools.partial(
        _pseudo_spectra_kernel, modes=modes, bandwidth=bandwidth,
        cin=Cin, cout=Cout, modes_pad=modes_pad, use_mxu_band=use_mxu)

    grid_spec = pltpu.PrefetchScalarGridSpec(
        num_scalar_prefetch=0,
        grid=(grid_steps,),
        in_specs=[
            pl.BlockSpec((Cin, bb, Nx), lambda g: (0, g, 0)),
            # Constant-index operands: not re-fetched between grid steps.
            pl.BlockSpec((Nx, kp_pad), lambda g: (0, 0)),
            pl.BlockSpec((modes, Nx), lambda g: (0, 0)),
            pl.BlockSpec(tuple(w_packed.shape),
                         lambda g, _nd=w_packed.ndim: (0,) * _nd),
        ],
        out_specs=pl.BlockSpec((Cout, bb, Nx), lambda g: (0, g, 0)),
    )

    band_flops = (2 * b_pad * Cin * kp_pad * Cout * modes_pad if use_mxu
                  else 2 * b_pad * bandwidth * Cin * Cout * modes)
    flops = (2 * b_pad * Cin * Nx * kp_pad          # forward transform
             + band_flops                           # banded contraction
             + 2 * b_pad * Cout * modes * Nx)       # inverse transform
    bytes_accessed = (b_pad * Cin * Nx * cdt.itemsize
                      + b_pad * Cout * Nx * out_size
                      + const_misc + w_bytes)
    cost = pl.CostEstimate(flops=int(flops), transcendentals=0,
                           bytes_accessed=int(bytes_accessed))

    out3 = pl.pallas_call(
        kernel,
        grid_spec=grid_spec,
        out_shape=jax.ShapeDtypeStruct((Cout, b_pad, Nx), out_dtype),
        compiler_params=pltpu.CompilerParams(
            dimension_semantics=("parallel",),
            vmem_limit_bytes=int(vmem_limit)),
        cost_estimate=cost,
    )(u3, tfwd, tinv, w_packed)

    return jnp.transpose(out3[:, :B, :], (1, 0, 2))


def _reference(u, weights, tmat, modes, bandwidth, triL):
    """Pure-JAX replica of the PyTorch forward for validation."""
    b = jnp.einsum('bin,kn->bik', u, tmat)                      # T(u)
    b = jnp.pad(b, ((0, 0), (0, 0), (triL, 0)))
    bp = b[..., :modes + bandwidth - 1]
    # torch .unfold(-1, bw, 1) -> (B, Cin, modes, bw)
    xpad = jnp.stack([bp[..., x:x + bandwidth] for x in range(modes)], axis=2)
    out_m = jnp.einsum('bixw,xiow->box', xpad, weights)
    out = jnp.zeros((u.shape[0], weights.shape[2], u.shape[2]), u.dtype)
    out = out.at[..., :modes].set(out_m)
    return jnp.einsum('bok,kn->bon', out, tmat)                 # T.inv(out)


if __name__ == "__main__":
    def run_case(B, Cin, Cout, Nx, modes, bandwidth, triL, *, compute_dtype,
                 contraction="auto", block_batch=None, rtol, atol):
        key = jax.random.PRNGKey(0)
        ku, kw = jax.random.split(key)
        u = jax.random.normal(ku, (B, Cin, Nx), dtype=jnp.float32)
        scale = 1.0 / (Cin * Cout)
        weights = scale * jax.random.uniform(
            kw, (modes, Cin, Cout, bandwidth), dtype=jnp.float32)
        tmat = jnp.asarray(_dct_matrix(Nx))

        y = pseudo_spectra_1d(u, weights, tmat, modes=modes,
                              bandwidth=bandwidth, triL=triL,
                              block_batch=block_batch,
                              compute_dtype=compute_dtype,
                              contraction=contraction)
        y = jax.block_until_ready(y)
        y_ref = _reference(u, weights, tmat, modes, bandwidth, triL)
        assert y.shape == (B, Cout, Nx)
        np.testing.assert_allclose(np.asarray(y), np.asarray(y_ref),
                                   rtol=rtol, atol=atol)

    # Exact path (f32 operands, MXU block-banded contraction).
    run_case(2, 4, 4, 16, 8, 3, 1, compute_dtype=jnp.float32,
             rtol=2e-4, atol=1e-5)
    # Default fast path (bf16 MXU operands, f32 accumulation).
    run_case(2, 4, 4, 16, 8, 3, 1, compute_dtype=jnp.bfloat16,
             rtol=5e-2, atol=1e-2)
    # Multi-step grid + batch padding (3 grid steps, channel-major blocks).
    run_case(20, 4, 4, 128, 16, 2, 0, compute_dtype=jnp.bfloat16,
             block_batch=8, rtol=5e-2, atol=1e-2)
    # VPU contraction path (hoisted shifted segments, per-channel accumulators).
    run_case(4, 4, 4, 64, 12, 3, 2, compute_dtype=jnp.float32,
             contraction="vpu", rtol=2e-4, atol=1e-5)

    print("KERNEL_OK")
</pallas_src>

<mosaic_0001>
module attributes {stable_mosaic.version = 11 : i64} {
  func.func @_pseudo_spectra_kernel(%arg0: i32, %arg1: memref<4x8x16xf32, #tpu.memory_space<vmem>>, %arg2: memref<16x128xf32, #tpu.memory_space<vmem>>, %arg3: memref<8x16xf32, #tpu.memory_space<vmem>>, %arg4: memref<4x128x512xf32, #tpu.memory_space<vmem>>, %arg5: memref<4x8x16xf32, #tpu.memory_space<vmem>>) attributes {dimension_semantics = [#tpu.dimension_semantics<parallel>], iteration_bounds = array<i64: 1>, scalar_prefetch = 0 : i64, scratch_operands = 0 : i64, tpu.core_type = #tpu.core_type<tc>, window_params = [{transform_indices = @transform_0, window_bounds = array<i64: 4, 8, 16>}, {pipeline_mode = #tpu.pipeline_mode<synchronous>, transform_indices = @transform_1, window_bounds = array<i64: 16, 128>}, {pipeline_mode = #tpu.pipeline_mode<synchronous>, transform_indices = @transform_2, window_bounds = array<i64: 8, 16>}, {pipeline_mode = #tpu.pipeline_mode<synchronous>, transform_indices = @transform_3, window_bounds = array<i64: 4, 128, 512>}, {transform_indices = @transform_4, window_bounds = array<i64: 4, 8, 16>}]} {
    %c0 = arith.constant 0 : index
    %c0_0 = arith.constant 0 : index
    %0 = vector.load %arg2[%c0, %c0_0] : memref<16x128xf32, #tpu.memory_space<vmem>>, vector<16x128xf32>
    %c0_1 = arith.constant 0 : index
    %c0_2 = arith.constant 0 : index
    %1 = vector.load %arg3[%c0_1, %c0_2] : memref<8x16xf32, #tpu.memory_space<vmem>>, vector<8x16xf32>
    %c0_3 = arith.constant 0 : index
    %c0_4 = arith.constant 0 : index
    %c0_5 = arith.constant 0 : index
    %2 = vector.load %arg1[%c0_3, %c0_4, %c0_5] : memref<4x8x16xf32, #tpu.memory_space<vmem>>, vector<4x8x16xf32>
    %3 = vector.shape_cast %2 : vector<4x8x16xf32> to vector<32x16xf32>
    %cst = arith.constant dense<0.000000e+00> : vector<32x128xf32>
    %4 = tpu.matmul %3, %0, %cst {dimension_numbers = #tpu.dot_dimension_numbers<[1], [0], [0], [1], [0, 0, 1, 1], [], []>} : vector<32x16xf32>, vector<16x128xf32>, vector<32x128xf32> -> vector<32x128xf32>
    %cst_6 = arith.constant 0.000000e+00 : f32
    %5 = vector.broadcast %cst_6 : f32 to vector<8x512xf32>
    %6 = vector.extract_strided_slice %4 {offsets = [0, 0], sizes = [8, 128], strides = [1, 1]} : vector<32x128xf32> to vector<8x128xf32>
    %c0_7 = arith.constant 0 : index
    %c0_8 = arith.constant 0 : index
    %c0_9 = arith.constant 0 : index
    %7 = vector.load %arg4[%c0_7, %c0_8, %c0_9] : memref<4x128x512xf32, #tpu.memory_space<vmem>>, vector<1x128x512xf32>
    %8 = vector.shape_cast %7 : vector<1x128x512xf32> to vector<128x512xf32>
    %cst_10 = arith.constant dense<0.000000e+00> : vector<8x512xf32>
    %9 = tpu.matmul %6, %8, %cst_10 {dimension_numbers = #tpu.dot_dimension_numbers<[1], [0], [0], [1], [0, 0, 1, 1], [], []>} : vector<8x128xf32>, vector<128x512xf32>, vector<8x512xf32> -> vector<8x512xf32>
    %10 = arith.addf %5, %9 : vector<8x512xf32>
    %11 = vector.extract_strided_slice %4 {offsets = [8, 0], sizes = [8, 128], strides = [1, 1]} : vector<32x128xf32> to vector<8x128xf32>
    %c1 = arith.constant 1 : index
    %c0_11 = arith.constant 0 : index
    %c0_12 = arith.constant 0 : index
    %12 = vector.load %arg4[%c1, %c0_11, %c0_12] : memref<4x128x512xf32, #tpu.memory_space<vmem>>, vector<1x128x512xf32>
    %13 = vector.shape_cast %12 : vector<1x128x512xf32> to vector<128x512xf32>
    %cst_13 = arith.constant dense<0.000000e+00> : vector<8x512xf32>
    %14 = tpu.matmul %11, %13, %cst_13 {dimension_numbers = #tpu.dot_dimension_numbers<[1], [0], [0], [1], [0, 0, 1, 1], [], []>} : vector<8x128xf32>, vector<128x512xf32>, vector<8x512xf32> -> vector<8x512xf32>
    %15 = arith.addf %10, %14 : vector<8x512xf32>
    %16 = vector.extract_strided_slice %4 {offsets = [16, 0], sizes = [8, 128], strides = [1, 1]} : vector<32x128xf32> to vector<8x128xf32>
    %c2 = arith.constant 2 : index
    %c0_14 = arith.constant 0 : index
    %c0_15 = arith.constant 0 : index
    %17 = vector.load %arg4[%c2, %c0_14, %c0_15] : memref<4x128x512xf32, #tpu.memory_space<vmem>>, vector<1x128x512xf32>
    %18 = vector.shape_cast %17 : vector<1x128x512xf32> to vector<128x512xf32>
    %cst_16 = arith.constant dense<0.000000e+00> : vector<8x512xf32>
    %19 = tpu.matmul %16, %18, %cst_16 {dimension_numbers = #tpu.dot_dimension_numbers<[1], [0], [0], [1], [0, 0, 1, 1], [], []>} : vector<8x128xf32>, vector<128x512xf32>, vector<8x512xf32> -> vector<8x512xf32>
    %20 = arith.addf %15, %19 : vector<8x512xf32>
    %21 = vector.extract_strided_slice %4 {offsets = [24, 0], sizes = [8, 128], strides = [1, 1]} : vector<32x128xf32> to vector<8x128xf32>
    %c3 = arith.constant 3 : index
    %c0_17 = arith.constant 0 : index
    %c0_18 = arith.constant 0 : index
    %22 = vector.load %arg4[%c3, %c0_17, %c0_18] : memref<4x128x512xf32, #tpu.memory_space<vmem>>, vector<1x128x512xf32>
    %23 = vector.shape_cast %22 : vector<1x128x512xf32> to vector<128x512xf32>
    %cst_19 = arith.constant dense<0.000000e+00> : vector<8x512xf32>
    %24 = tpu.matmul %21, %23, %cst_19 {dimension_numbers = #tpu.dot_dimension_numbers<[1], [0], [0], [1], [0, 0, 1, 1], [], []>} : vector<8x128xf32>, vector<128x512xf32>, vector<8x512xf32> -> vector<8x512xf32>
    %25 = arith.addf %20, %24 : vector<8x512xf32>
    %26 = vector.extract_strided_slice %25 {offsets = [0, 0], sizes = [8, 8], strides = [1, 1]} : vector<8x512xf32> to vector<8x8xf32>
    %cst_20 = arith.constant dense<0.000000e+00> : vector<8x16xf32>
    %27 = tpu.matmul %26, %1, %cst_20 {dimension_numbers = #tpu.dot_dimension_numbers<[1], [0], [0], [1], [0, 0, 1, 1], [], []>} : vector<8x8xf32>, vector<8x16xf32>, vector<8x16xf32> -> vector<8x16xf32>
    %c0_21 = arith.constant 0 : index
    %c0_22 = arith.constant 0 : index
    %c0_23 = arith.constant 0 : index
    %28 = vector.load %arg5[%c0_21, %c0_22, %c0_23] : memref<4x8x16xf32, #tpu.memory_space<vmem>>, vector<1x8x16xf32>
    %29 = vector.shape_cast %28 : vector<1x8x16xf32> to vector<8x16xf32>
    %30 = vector.shape_cast %27 : vector<8x16xf32> to vector<1x8x16xf32>
    tpu.vector_store %arg5[%c0_21, %c0_22, %c0_23], %30 {strides = array<i32>} : memref<4x8x16xf32, #tpu.memory_space<vmem>>, vector<1x8x16xf32>,
    %31 = vector.extract_strided_slice %25 {offsets = [0, 128], sizes = [8, 8], strides = [1, 1]} : vector<8x512xf32> to vector<8x8xf32>
    %cst_24 = arith.constant dense<0.000000e+00> : vector<8x16xf32>
    %32 = tpu.matmul %31, %1, %cst_24 {dimension_numbers = #tpu.dot_dimension_numbers<[1], [0], [0], [1], [0, 0, 1, 1], [], []>} : vector<8x8xf32>, vector<8x16xf32>, vector<8x16xf32> -> vector<8x16xf32>
    %c1_25 = arith.constant 1 : index
    %c0_26 = arith.constant 0 : index
    %c0_27 = arith.constant 0 : index
    %33 = vector.load %arg5[%c1_25, %c0_26, %c0_27] : memref<4x8x16xf32, #tpu.memory_space<vmem>>, vector<1x8x16xf32>
    %34 = vector.shape_cast %33 : vector<1x8x16xf32> to vector<8x16xf32>
    %35 = vector.shape_cast %32 : vector<8x16xf32> to vector<1x8x16xf32>
    tpu.vector_store %arg5[%c1_25, %c0_26, %c0_27], %35 {strides = array<i32>} : memref<4x8x16xf32, #tpu.memory_space<vmem>>, vector<1x8x16xf32>,
    %36 = vector.extract_strided_slice %25 {offsets = [0, 256], sizes = [8, 8], strides = [1, 1]} : vector<8x512xf32> to vector<8x8xf32>
    %cst_28 = arith.constant dense<0.000000e+00> : vector<8x16xf32>
    %37 = tpu.matmul %36, %1, %cst_28 {dimension_numbers = #tpu.dot_dimension_numbers<[1], [0], [0], [1], [0, 0, 1, 1], [], []>} : vector<8x8xf32>, vector<8x16xf32>, vector<8x16xf32> -> vector<8x16xf32>
    %c2_29 = arith.constant 2 : index
    %c0_30 = arith.constant 0 : index
    %c0_31 = arith.constant 0 : index
    %38 = vector.load %arg5[%c2_29, %c0_30, %c0_31] : memref<4x8x16xf32, #tpu.memory_space<vmem>>, vector<1x8x16xf32>
    %39 = vector.shape_cast %38 : vector<1x8x16xf32> to vector<8x16xf32>
    %40 = vector.shape_cast %37 : vector<8x16xf32> to vector<1x8x16xf32>
    tpu.vector_store %arg5[%c2_29, %c0_30, %c0_31], %40 {strides = array<i32>} : memref<4x8x16xf32, #tpu.memory_space<vmem>>, vector<1x8x16xf32>,
    %41 = vector.extract_strided_slice %25 {offsets = [0, 384], sizes = [8, 8], strides = [1, 1]} : vector<8x512xf32> to vector<8x8xf32>
    %cst_32 = arith.constant dense<0.000000e+00> : vector<8x16xf32>
    %42 = tpu.matmul %41, %1, %cst_32 {dimension_numbers = #tpu.dot_dimension_numbers<[1], [0], [0], [1], [0, 0, 1, 1], [], []>} : vector<8x8xf32>, vector<8x16xf32>, vector<8x16xf32> -> vector<8x16xf32>
    %c3_33 = arith.constant 3 : index
    %c0_34 = arith.constant 0 : index
    %c0_35 = arith.constant 0 : index
    %43 = vector.load %arg5[%c3_33, %c0_34, %c0_35] : memref<4x8x16xf32, #tpu.memory_space<vmem>>, vector<1x8x16xf32>
    %44 = vector.shape_cast %43 : vector<1x8x16xf32> to vector<8x16xf32>
    %45 = vector.shape_cast %42 : vector<8x16xf32> to vector<1x8x16xf32>
    tpu.vector_store %arg5[%c3_33, %c0_34, %c0_35], %45 {strides = array<i32>} : memref<4x8x16xf32, #tpu.memory_space<vmem>>, vector<1x8x16xf32>,
    return
  }
  func.func @transform_0(%arg0: i32) -> (i32, i32, i32) {
    %c0_i32 = arith.constant 0 : i32
    %c0_i32_0 = arith.constant 0 : i32
    %c0_i32_1 = arith.constant 0 : i32
    return %c0_i32, %arg0, %c0_i32_0 : i32, i32, i32
  }
  func.func @transform_1(%arg0: i32) -> (i32, i32) {
    %c0_i32 = arith.constant 0 : i32
    %c0_i32_0 = arith.constant 0 : i32
    %c0_i32_1 = arith.constant 0 : i32
    return %c0_i32, %c0_i32_0 : i32, i32
  }
  func.func @transform_2(%arg0: i32) -> (i32, i32) {
    %c0_i32 = arith.constant 0 : i32
    %c0_i32_0 = arith.constant 0 : i32
    %c0_i32_1 = arith.constant 0 : i32
    return %c0_i32, %c0_i32_0 : i32, i32
  }
  func.func @transform_3(%arg0: i32) -> (i32, i32, i32) {
    %c0_i32 = arith.constant 0 : i32
    %c0_i32_0 = arith.constant 0 : i32
    %c0_i32_1 = arith.constant 0 : i32
    %c0_i32_2 = arith.constant 0 : i32
    return %c0_i32, %c0_i32_0, %c0_i32_1 : i32, i32, i32
  }
  func.func @transform_4(%arg0: i32) -> (i32, i32, i32) {
    %c0_i32 = arith.constant 0 : i32
    %c0_i32_0 = arith.constant 0 : i32
    %c0_i32_1 = arith.constant 0 : i32
    return %c0_i32, %arg0, %c0_i32_0 : i32, i32, i32
  }
}

</mosaic_0001>

<bundles_post_ra>
// kernel: tpu_custom_call.1
= control target key start
LH: loop header
LB: loop body
LE: loop exit
PB: predicated region body
PF: predicated region fallthrough
CT: control target
= control target key end

     0   :  { %9 = vsyncpa [#allocation3], 0  ;;  %s1047_s0 = inlined_call_operand.hbm [shape: f32[4,8,16], index: 0, kind: input, shape index: {}]   ;;  %s1048_s1 = inlined_call_operand.hbm [shape: f32[16,128], index: 1, kind: input, shape index: {}]   ;;  %s1049_s2 = inlined_call_operand.hbm [shape: f32[8,16], index: 2, kind: input, shape index: {}]   ;;  %s1050_s3 = inlined_call_operand.hbm [shape: f32[4,128,512], index: 3, kind: input, shape index: {}]   ;;  %s1051_s4 = inlined_call_operand.hbm [shape: f32[4,8,16], index: 4, kind: output, shape index: {}]  }
   0x1   :  { %10 = vsyncpa [#allocation6], 0 }
   0x2   :  { %11 = vsyncpa [#allocation9], 0 }
   0x3   :  { %12 = vsyncpa [#allocation4], 0  ;;  %s30_s17 = sshll.u32 %s1048_s1, 4  ;;  %s981_s18 = smov [#allocation5]   ;;  %s31_s17 = int_to_ptr.hbm [resolvable:$true] %s30_s17 }
   0x4   :  { %s32_s19 = sshll.u32 %s981_s18, 4  ;;  %s17_s22 = sshll.u32 %s1047_s0, 4  ;;  %s33_s19 = int_to_ptr.vmem [resolvable:$true] %s32_s19  ;;  %s18_s22 = int_to_ptr.hbm [resolvable:$true] %s17_s22 }
   0x5   :  { %s982_s23 = smov 128   ;;  %s983_s24 = smov 8  }
   0x6   :  { %38 = dma.hbm_to_vmem [thread:$0]  %s31_s17, 256, %s33_s19, [#allocation6], %s982_s23, %s982_s23, %s983_s24  }
   0x7   :  { %s984_s25 = smov [#allocation2]   ;;  %s44_s1 = sshll.u32 %s1049_s2, 4  ;;  %s45_s1 = int_to_ptr.hbm [resolvable:$true] %s44_s1 }
   0x8   :  { %s19_s26 = sshll.u32 %s984_s25, 4  ;;  %s54_s30 = sshll.u32 %s1050_s3, 4  ;;  %s20_s26 = int_to_ptr.vmem [resolvable:$true] %s19_s26  ;;  %s55_s30 = int_to_ptr.hbm [resolvable:$true] %s54_s30 }
   0x9   :  { %25 = dma.hbm_to_vmem [thread:$0]  %s18_s22, 512, %s20_s26, [#allocation3], %s982_s23, %s982_s23, %s983_s24  }
   0xa   :  { %s985_s5 = smov [#allocation7]   ;;  %s986_s7 = smov [#allocation8]  }
   0xb   :  { %s46_s6 = sshll.u32 %s985_s5, 4  ;;  %s56_s8 = sshll.u32 %s986_s7, 4  ;;  %s47_s6 = int_to_ptr.vmem [resolvable:$true] %s46_s6  ;;  %s57_s8 = int_to_ptr.vmem [resolvable:$true] %s56_s8 }
   0xc   :  { %49 = dma.hbm_to_vmem [thread:$0]  %s45_s1, 128, %s47_s6, [#allocation6]  }
   0xd   :  { %s987_s9 = smov 512   ;;  %s988_s2 = smov 32  }
   0xe   :  { %62 = dma.hbm_to_vmem [thread:$0]  %s55_s30, 32768, %s57_s8, [#allocation9], %s987_s9, %s987_s9, %s988_s2  }
   0xf   :  { %973 = dma.done.wait [#allocation3], 512  }
  0x10   :  { %974 = vsyncadd [#allocation3], 4294966784 }
  0x11   :  { %975 = dma.done.wait [#allocation6], 384  }
  0x12   :  { %976 = vsyncadd [#allocation6], 4294966912 }
  0x13   :  { %977 = dma.done.wait [#allocation9], 32768  }
  0x14   :  { %978 = vsyncadd [#allocation9], 4294934528  ;;  %v80_v0 = vld [vmem:[#allocation5 + $0x8] sm:$0xff]  ;;  %v79_v1 = vld [vmem:[#allocation5] sm:$0xff]  ;;  %vm86_vm0 = vcmask 130048   ;;  %vm715_vm1 = vcmask 64512  }
  0x15   :  { %113 = vmatpush.msra.mxu0 %v80_v0  ;;  %v82_v2 = vld [vmem:[#allocation2] sm:$0xff]  ;;  %v253_v3 = vld [vmem:[#allocation8 + $0x3e0] sm:$0xff]  ;;  %v255_v5 = vld [vmem:[#allocation8 + $0x3f0] sm:$0xff]  ;;  %s989_s3 = smov [#allocation10]   ;;  %s821_s13 = sshll.u32 %s1051_s4, 4  ;;  %s822_s13 = int_to_ptr.hbm [resolvable:$true] %s821_s13 }
  0x16   :  { %v254_v4 = vld [vmem:[#allocation8 + $0x3e8] sm:$0xff]  ;;  %257 = vmatpush.msra.mxu1 %v253_v3  ;;  %v256_v6 = vld [vmem:[#allocation8 + $0x3f8] sm:$0xff]  ;;  %v249_v7 = vld [vmem:[#allocation8 + $0x3c0] sm:$0xff]  ;;  %297 = vmatpush.msra.mxu3 %v255_v5  ;;  %s819_s10 = sshll.u32 %s989_s3, 4  ;;  %s820_s10 = int_to_ptr.vmem [resolvable:$true] %s819_s10 }
  0x17   :  { %114 = vmatpush.msra.mxu0 %v79_v1  ;;  %v250_v8 = vld [vmem:[#allocation8 + $0x3c8] sm:$0xff]  ;;  %277 = vmatpush.msra.mxu2 %v254_v4  ;;  %v251_v9 = vld [vmem:[#allocation8 + $0x3d0] sm:$0xff]  ;;  %v252_v10 = vld [vmem:[#allocation8 + $0x3d8] sm:$0xff] }
  0x18   :  { %836 = vmatmul.msk.f32.vlgmr.msra.gmra.mxu0 %vm86_vm0, %v82_v2  ;;  %v245_v11 = vld [vmem:[#allocation8 + $0x3a0] sm:$0xff]  ;;  %v246_v12 = vld [vmem:[#allocation8 + $0x3a8] sm:$0xff]  ;;  %258 = vmatpush.msra.mxu1 %v249_v7  ;;  %v247_v13 = vld [vmem:[#allocation8 + $0x3b0] sm:$0xff] }
  0x19   :  { %317 = vmatpush.msrb.mxu0 %v256_v6  ;;  %278 = vmatpush.msra.mxu2 %v250_v8  ;;  %v248_v14 = vld [vmem:[#allocation8 + $0x3b8] sm:$0xff]  ;;  %v241_v15 = vld [vmem:[#allocation8 + $0x380] sm:$0xff]  ;;  %v242_v16 = vld [vmem:[#allocation8 + $0x388] sm:$0xff] }
  0x1a   :  { %298 = vmatpush.msra.mxu3 %v251_v9  ;;  %259 = vmatpush.msra.mxu1 %v245_v11  ;;  %v243_v17 = vld [vmem:[#allocation8 + $0x390] sm:$0xff]  ;;  %v244_v18 = vld [vmem:[#allocation8 + $0x398] sm:$0xff]  ;;  %v237_v20 = vld [vmem:[#allocation8 + $0x360] sm:$0xff] }
  0x1b   :  { %318 = vmatpush.msrb.mxu0 %v252_v10  ;;  %279 = vmatpush.msra.mxu2 %v246_v12  ;;  %v83_v19 = vld [vmem:[#allocation2 + $0x8] sm:$0xff]  ;;  %v238_v21 = vld [vmem:[#allocation8 + $0x368] sm:$0xff]  ;;  %v240_v23 = vld [vmem:[#allocation8 + $0x378] sm:$0xff] }
  0x1c   :  { %299 = vmatpush.msra.mxu3 %v247_v13  ;;  %260 = vmatpush.msra.mxu1 %v241_v15  ;;  %v239_v22 = vld [vmem:[#allocation8 + $0x370] sm:$0xff]  ;;  %v233_v24 = vld [vmem:[#allocation8 + $0x340] sm:$0xff]  ;;  %v234_v25 = vld [vmem:[#allocation8 + $0x348] sm:$0xff] }
  0x1d   :  { %319 = vmatpush.msrb.mxu0 %v248_v14  ;;  %280 = vmatpush.msra.mxu2 %v242_v16  ;;  %v235_v26 = vld [vmem:[#allocation8 + $0x350] sm:$0xff]  ;;  %v236_v27 = vld [vmem:[#allocation8 + $0x358] sm:$0xff]  ;;  %v229_v28 = vld [vmem:[#allocation8 + $0x320] sm:$0xff] }
  0x1e   :  { %300 = vmatpush.msra.mxu3 %v243_v17  ;;  %261 = vmatpush.msra.mxu1 %v237_v20  ;;  %v230_v29 = vld [vmem:[#allocation8 + $0x328] sm:$0xff]  ;;  %v231_v30 = vld [vmem:[#allocation8 + $0x330] sm:$0xff]  ;;  %v232_v31 = vld [vmem:[#allocation8 + $0x338] sm:$0xff] }
  0x1f   :  { %320 = vmatpush.msrb.mxu0 %v244_v18  ;;  %281 = vmatpush.msra.mxu2 %v238_v21  ;;  %v225_v32 = vld [vmem:[#allocation8 + $0x300] sm:$0xff]  ;;  %v226_v33 = vld [vmem:[#allocation8 + $0x308] sm:$0xff]  ;;  %v227_v34 = vld [vmem:[#allocation8 + $0x310] sm:$0xff] }
  0x20   :  { %837 = vmatmul.msk.f32.gmra.mxu0 %vm86_vm0, %v83_v19  ;;  %301 = vmatpush.msra.mxu3 %v239_v22  ;;  %v84_v35 = vld [vmem:[#allocation2 + $0x10] sm:$0xff]  ;;  %v221_v36 = vld [vmem:[#allocation8 + $0x2e0] sm:$0xff]  ;;  %v222_v38 = vld [vmem:[#allocation8 + $0x2e8] sm:$0xff] }
  0x21   :  { %321 = vmatpush.msrb.mxu0 %v240_v23  ;;  %262 = vmatpush.msra.mxu1 %v233_v24  ;;  %v228_v37 = vld [vmem:[#allocation8 + $0x318] sm:$0xff]  ;;  %v223_v39 = vld [vmem:[#allocation8 + $0x2f0] sm:$0xff]  ;;  %v217_v40 = vld [vmem:[#allocation8 + $0x2c0] sm:$0xff] }
  0x22   :  { %282 = vmatpush.msra.mxu2 %v234_v25  ;;  %302 = vmatpush.msra.mxu3 %v235_v26  ;;  %v224_v41 = vld [vmem:[#allocation8 + $0x2f8] sm:$0xff]  ;;  %v218_v42 = vld [vmem:[#allocation8 + $0x2c8] sm:$0xff]  ;;  %v219_v43 = vld [vmem:[#allocation8 + $0x2d0] sm:$0xff] }
  0x23   :  { %322 = vmatpush.msrb.mxu0 %v236_v27  ;;  %263 = vmatpush.msra.mxu1 %v229_v28  ;;  %v213_v44 = vld [vmem:[#allocation8 + $0x2a0] sm:$0xff]  ;;  %v220_v45 = vld [vmem:[#allocation8 + $0x2d8] sm:$0xff]  ;;  %v214_v46 = vld [vmem:[#allocation8 + $0x2a8] sm:$0xff] }
  0x24   :  { %283 = vmatpush.msra.mxu2 %v230_v29  ;;  %303 = vmatpush.msra.mxu3 %v231_v30  ;;  %v215_v47 = vld [vmem:[#allocation8 + $0x2b0] sm:$0xff]  ;;  %v209_v48 = vld [vmem:[#allocation8 + $0x280] sm:$0xff]  ;;  %v216_v49 = vld [vmem:[#allocation8 + $0x2b8] sm:$0xff] }
  0x25   :  { %323 = vmatpush.msrb.mxu0 %v232_v31  ;;  %264 = vmatpush.msra.mxu1 %v225_v32  ;;  %v210_v50 = vld [vmem:[#allocation8 + $0x288] sm:$0xff]  ;;  %v85_v51 = vld [vmem:[#allocation2 + $0x18] sm:$0xff]  ;;  %v211_v52 = vld [vmem:[#allocation8 + $0x290] sm:$0xff] }
  0x26   :  { %284 = vmatpush.msra.mxu2 %v226_v33  ;;  %304 = vmatpush.msra.mxu3 %v227_v34  ;;  %v212_v53 = vld [vmem:[#allocation8 + $0x298] sm:$0xff]  ;;  %v205_v54 = vld [vmem:[#allocation8 + $0x260] sm:$0xff]  ;;  %v206_v55 = vld [vmem:[#allocation8 + $0x268] sm:$0xff] }
  0x27   :  { %265 = vmatpush.msra.mxu1 %v221_v36  ;;  %324 = vmatpush.msrb.mxu0 %v228_v37  ;;  %v207_v56 = vld [vmem:[#allocation8 + $0x270] sm:$0xff]  ;;  %v208_v57 = vld [vmem:[#allocation8 + $0x278] sm:$0xff]  ;;  %v201_v58 = vld [vmem:[#allocation8 + $0x240] sm:$0xff] }
  0x28   :  { %838 = vmatmul.msk.f32.gmra.mxu0 %vm86_vm0, %v84_v35  ;;  %285 = vmatpush.msra.mxu2 %v222_v38  ;;  %v202_v59 = vld [vmem:[#allocation8 + $0x248] sm:$0xff]  ;;  %v203_v60 = vld [vmem:[#allocation8 + $0x250] sm:$0xff]  ;;  %v204_v61 = vld [vmem:[#allocation8 + $0x258] sm:$0xff] }
  0x29   :  { %305 = vmatpush.msra.mxu3 %v223_v39  ;;  %266 = vmatpush.msra.mxu1 %v217_v40  ;;  %v197_v62 = vld [vmem:[#allocation8 + $0x220] sm:$0xff]  ;;  %v198_v63 = vld [vmem:[#allocation8 + $0x228] sm:$0xff]  ;;  %v199_v0 = vld [vmem:[#allocation8 + $0x230] sm:$0xff] }
  0x2a   :  { %325 = vmatpush.msrb.mxu0 %v224_v41  ;;  %286 = vmatpush.msra.mxu2 %v218_v42  ;;  %v200_v1 = vld [vmem:[#allocation8 + $0x238] sm:$0xff]  ;;  %v193_v2 = vld [vmem:[#allocation8 + $0x200] sm:$0xff]  ;;  %v194_v3 = vld [vmem:[#allocation8 + $0x208] sm:$0xff] }
  0x2b   :  { %306 = vmatpush.msra.mxu3 %v219_v43  ;;  %267 = vmatpush.msra.mxu1 %v213_v44  ;;  %v195_v4 = vld [vmem:[#allocation8 + $0x210] sm:$0xff]  ;;  %v196_v5 = vld [vmem:[#allocation8 + $0x218] sm:$0xff]  ;;  %v188_v6 = vld [vmem:[#allocation8 + $0x1e0] sm:$0xff] }
  0x2c   :  { %326 = vmatpush.msrb.mxu0 %v220_v45  ;;  %287 = vmatpush.msra.mxu2 %v214_v46  ;;  %v189_v7 = vld [vmem:[#allocation8 + $0x1e8] sm:$0xff]  ;;  %v190_v8 = vld [vmem:[#allocation8 + $0x1f0] sm:$0xff]  ;;  %v191_v9 = vld [vmem:[#allocation8 + $0x1f8] sm:$0xff] }
  0x2d   :  { %307 = vmatpush.msra.mxu3 %v215_v47  ;;  %268 = vmatpush.msra.mxu1 %v209_v48  ;;  %v184_v10 = vld [vmem:[#allocation8 + $0x1c0] sm:$0xff]  ;;  %v185_v11 = vld [vmem:[#allocation8 + $0x1c8] sm:$0xff]  ;;  %v186_v12 = vld [vmem:[#allocation8 + $0x1d0] sm:$0xff] }
  0x2e   :  { %327 = vmatpush.msrb.mxu0 %v216_v49  ;;  %288 = vmatpush.msra.mxu2 %v210_v50  ;;  %v187_v13 = vld [vmem:[#allocation8 + $0x1d8] sm:$0xff]  ;;  %v180_v14 = vld [vmem:[#allocation8 + $0x1a0] sm:$0xff]  ;;  %v181_v15 = vld [vmem:[#allocation8 + $0x1a8] sm:$0xff] }
  0x2f   :  { %308 = vmatpush.msra.mxu3 %v211_v52  ;;  %269 = vmatpush.msra.mxu1 %v205_v54  ;;  %v182_v16 = vld [vmem:[#allocation8 + $0x1b0] sm:$0xff]  ;;  %v183_v17 = vld [vmem:[#allocation8 + $0x1b8] sm:$0xff]  ;;  %v176_v18 = vld [vmem:[#allocation8 + $0x180] sm:$0xff] }
  0x30   :  { %839 = vmatmul.msk.f32.gmra.mxu0 %vm86_vm0, %v85_v51  ;;  %289 = vmatpush.msra.mxu2 %v206_v55  ;;  %v177_v19 = vld [vmem:[#allocation8 + $0x188] sm:$0xff]  ;;  %v178_v20 = vld [vmem:[#allocation8 + $0x190] sm:$0xff]  ;;  %v179_v21 = vld [vmem:[#allocation8 + $0x198] sm:$0xff] }
  0x31   :  { %328 = vmatpush.msrb.mxu0 %v212_v53  ;;  %309 = vmatpush.msra.mxu3 %v207_v56  ;;  %v172_v22 = vld [vmem:[#allocation8 + $0x160] sm:$0xff]  ;;  %v173_v23 = vld [vmem:[#allocation8 + $0x168] sm:$0xff]  ;;  %v174_v24 = vld [vmem:[#allocation8 + $0x170] sm:$0xff] }
  0x32   :  { %270 = vmatpush.msra.mxu1 %v201_v58  ;;  %290 = vmatpush.msra.mxu2 %v202_v59  ;;  %v175_v25 = vld [vmem:[#allocation8 + $0x178] sm:$0xff]  ;;  %v168_v26 = vld [vmem:[#allocation8 + $0x140] sm:$0xff]  ;;  %v169_v27 = vld [vmem:[#allocation8 + $0x148] sm:$0xff] }
  0x33   :  { %329 = vmatpush.msrb.mxu0 %v208_v57  ;;  %310 = vmatpush.msra.mxu3 %v203_v60  ;;  %v170_v28 = vld [vmem:[#allocation8 + $0x150] sm:$0xff]  ;;  %v171_v29 = vld [vmem:[#allocation8 + $0x158] sm:$0xff]  ;;  %v164_v30 = vld [vmem:[#allocation8 + $0x120] sm:$0xff] }
  0x34   :  { %271 = vmatpush.msra.mxu1 %v197_v62  ;;  %291 = vmatpush.msra.mxu2 %v198_v63  ;;  %v165_v31 = vld [vmem:[#allocation8 + $0x128] sm:$0xff]  ;;  %v166_v32 = vld [vmem:[#allocation8 + $0x130] sm:$0xff]  ;;  %v167_v33 = vld [vmem:[#allocation8 + $0x138] sm:$0xff] }
  0x35   :  { %330 = vmatpush.msrb.mxu0 %v204_v61  ;;  %311 = vmatpush.msra.mxu3 %v199_v0  ;;  %v160_v34 = vld [vmem:[#allocation8 + $0x100] sm:$0xff]  ;;  %v161_v35 = vld [vmem:[#allocation8 + $0x108] sm:$0xff]  ;;  %v162_v36 = vld [vmem:[#allocation8 + $0x110] sm:$0xff] }
  0x36   :  { %272 = vmatpush.msra.mxu1 %v193_v2  ;;  %292 = vmatpush.msra.mxu2 %v194_v3  ;;  %v163_v37 = vld [vmem:[#allocation8 + $0x118] sm:$0xff]  ;;  %v156_v38 = vld [vmem:[#allocation8 + $0xe0] sm:$0xff]  ;;  %v157_v39 = vld [vmem:[#allocation8 + $0xe8] sm:$0xff] }
  0x37   :  { %331 = vmatpush.msrb.mxu0 %v200_v1  ;;  %312 = vmatpush.msra.mxu3 %v195_v4  ;;  %v158_v40 = vld [vmem:[#allocation8 + $0xf0] sm:$0xff]  ;;  %v159_v41 = vld [vmem:[#allocation8 + $0xf8] sm:$0xff]  ;;  %v152_v42 = vld [vmem:[#allocation8 + $0xc0] sm:$0xff] }
  0x38   :  { %337 = vmatpush.msrb.mxu1 %v188_v6  ;;  %357 = vmatpush.msrb.mxu2 %v189_v7  ;;  %v153_v43 = vld [vmem:[#allocation8 + $0xc8] sm:$0xff]  ;;  %v154_v44 = vld [vmem:[#allocation8 + $0xd0] sm:$0xff]  ;;  %v155_v45 = vld [vmem:[#allocation8 + $0xd8] sm:$0xff] }
  0x39   :  { %332 = vmatpush.msrb.mxu0 %v196_v5  ;;  %377 = vmatpush.msrb.mxu3 %v190_v8  ;;  %v148_v46 = vld [vmem:[#allocation8 + $0xa0] sm:$0xff]  ;;  %v149_v47 = vld [vmem:[#allocation8 + $0xa8] sm:$0xff]  ;;  %v150_v48 = vld [vmem:[#allocation8 + $0xb0] sm:$0xff] }
  0x3a   :  { %338 = vmatpush.msrb.mxu1 %v184_v10  ;;  %358 = vmatpush.msrb.mxu2 %v185_v11  ;;  %v151_v49 = vld [vmem:[#allocation8 + $0xb8] sm:$0xff]  ;;  %v144_v50 = vld [vmem:[#allocation8 + $0x80] sm:$0xff]  ;;  %v145_v51 = vld [vmem:[#allocation8 + $0x88] sm:$0xff] }
  0x3b   :  { %397 = vmatpush.msra.mxu0 %v191_v9  ;;  %378 = vmatpush.msrb.mxu3 %v186_v12  ;;  %v146_v52 = vld [vmem:[#allocation8 + $0x90] sm:$0xff]  ;;  %v147_v53 = vld [vmem:[#allocation8 + $0x98] sm:$0xff]  ;;  %v140_v54 = vld [vmem:[#allocation8 + $0x60] sm:$0xff] }
  0x3c   :  { %339 = vmatpush.msrb.mxu1 %v180_v14  ;;  %359 = vmatpush.msrb.mxu2 %v181_v15  ;;  %v141_v55 = vld [vmem:[#allocation8 + $0x68] sm:$0xff]  ;;  %v142_v56 = vld [vmem:[#allocation8 + $0x70] sm:$0xff]  ;;  %v143_v57 = vld [vmem:[#allocation8 + $0x78] sm:$0xff] }
  0x3d   :  { %398 = vmatpush.msra.mxu0 %v187_v13  ;;  %379 = vmatpush.msrb.mxu3 %v182_v16  ;;  %v136_v58 = vld [vmem:[#allocation8 + $0x40] sm:$0xff]  ;;  %v137_v59 = vld [vmem:[#allocation8 + $0x48] sm:$0xff]  ;;  %v138_v60 = vld [vmem:[#allocation8 + $0x50] sm:$0xff] }
  0x3e   :  { %340 = vmatpush.msrb.mxu1 %v176_v18  ;;  %360 = vmatpush.msrb.mxu2 %v177_v19  ;;  %v139_v61 = vld [vmem:[#allocation8 + $0x58] sm:$0xff]  ;;  %v132_v62 = vld [vmem:[#allocation8 + $0x20] sm:$0xff]  ;;  %v133_v63 = vld [vmem:[#allocation8 + $0x28] sm:$0xff] }
  0x3f   :  { %399 = vmatpush.msra.mxu0 %v183_v17  ;;  %380 = vmatpush.msrb.mxu3 %v178_v20  ;;  %v134_v0 = vld [vmem:[#allocation8 + $0x30] sm:$0xff]  ;;  %v135_v1 = vld [vmem:[#allocation8 + $0x38] sm:$0xff]  ;;  %v128_v2 = vld [vmem:[#allocation8] sm:$0xff] }
  0x40   :  { %341 = vmatpush.msrb.mxu1 %v172_v22  ;;  %361 = vmatpush.msrb.mxu2 %v173_v23  ;;  %v129_v3 = vld [vmem:[#allocation8 + $0x8] sm:$0xff]  ;;  %v130_v4 = vld [vmem:[#allocation8 + $0x10] sm:$0xff]  ;;  %v131_v5 = vld [vmem:[#allocation8 + $0x18] sm:$0xff] }
  0x41   :  { %400 = vmatpush.msra.mxu0 %v179_v21  ;;  %381 = vmatpush.msrb.mxu3 %v174_v24  ;;  %v478_v8 = vld [vmem:[#allocation8 + $0x5e0] sm:$0xff]  ;;  %v479_v9 = vld [vmem:[#allocation8 + $0x5e8] sm:$0xff]  ;;  %v480_v10 = vld [vmem:[#allocation8 + $0x5f0] sm:$0xff] }
  0x42   :  { %342 = vmatpush.msrb.mxu1 %v168_v26  ;;  %362 = vmatpush.msrb.mxu2 %v169_v27  ;;  %v481_v11 = vld [vmem:[#allocation8 + $0x5f8] sm:$0xff]  ;;  %v474_v12 = vld [vmem:[#allocation8 + $0x5c0] sm:$0xff]  ;;  %v475_v13 = vld [vmem:[#allocation8 + $0x5c8] sm:$0xff] }
  0x43   :  { %401 = vmatpush.msra.mxu0 %v175_v25  ;;  %382 = vmatpush.msrb.mxu3 %v170_v28  ;;  %v476_v14 = vld [vmem:[#allocation8 + $0x5d0] sm:$0xff]  ;;  %v477_v15 = vld [vmem:[#allocation8 + $0x5d8] sm:$0xff]  ;;  %v470_v16 = vld [vmem:[#allocation8 + $0x5a0] sm:$0xff] }
  0x44   :  { %343 = vmatpush.msrb.mxu1 %v164_v30  ;;  %363 = vmatpush.msrb.mxu2 %v165_v31  ;;  %v471_v17 = vld [vmem:[#allocation8 + $0x5a8] sm:$0xff]  ;;  %v472_v18 = vld [vmem:[#allocation8 + $0x5b0] sm:$0xff]  ;;  %v473_v19 = vld [vmem:[#allocation8 + $0x5b8] sm:$0xff] }
  0x45   :  { %402 = vmatpush.msra.mxu0 %v171_v29  ;;  %383 = vmatpush.msrb.mxu3 %v166_v32  ;;  %v466_v20 = vld [vmem:[#allocation8 + $0x580] sm:$0xff]  ;;  %v467_v21 = vld [vmem:[#allocation8 + $0x588] sm:$0xff]  ;;  %v468_v22 = vld [vmem:[#allocation8 + $0x590] sm:$0xff] }
  0x46   :  { %344 = vmatpush.msrb.mxu1 %v160_v34  ;;  %364 = vmatpush.msrb.mxu2 %v161_v35  ;;  %v469_v23 = vld [vmem:[#allocation8 + $0x598] sm:$0xff]  ;;  %v462_v24 = vld [vmem:[#allocation8 + $0x560] sm:$0xff]  ;;  %v463_v25 = vld [vmem:[#allocation8 + $0x568] sm:$0xff] }
  0x47   :  { %403 = vmatpush.msra.mxu0 %v167_v33  ;;  %384 = vmatpush.msrb.mxu3 %v162_v36  ;;  %v464_v26 = vld [vmem:[#allocation8 + $0x570] sm:$0xff]  ;;  %v465_v27 = vld [vmem:[#allocation8 + $0x578] sm:$0xff]  ;;  %v458_v28 = vld [vmem:[#allocation8 + $0x540] sm:$0xff] }
  0x48   :  { %345 = vmatpush.msrb.mxu1 %v156_v38  ;;  %365 = vmatpush.msrb.mxu2 %v157_v39  ;;  %v459_v29 = vld [vmem:[#allocation8 + $0x548] sm:$0xff]  ;;  %v460_v30 = vld [vmem:[#allocation8 + $0x550] sm:$0xff]  ;;  %v461_v31 = vld [vmem:[#allocation8 + $0x558] sm:$0xff] }
  0x49   :  { %404 = vmatpush.msra.mxu0 %v163_v37  ;;  %385 = vmatpush.msrb.mxu3 %v158_v40  ;;  %v454_v32 = vld [vmem:[#allocation8 + $0x520] sm:$0xff]  ;;  %v455_v33 = vld [vmem:[#allocation8 + $0x528] sm:$0xff]  ;;  %v456_v34 = vld [vmem:[#allocation8 + $0x530] sm:$0xff] }
  0x4a   :  { %346 = vmatpush.msrb.mxu1 %v152_v42  ;;  %366 = vmatpush.msrb.mxu2 %v153_v43  ;;  %v457_v35 = vld [vmem:[#allocation8 + $0x538] sm:$0xff]  ;;  %v450_v36 = vld [vmem:[#allocation8 + $0x500] sm:$0xff]  ;;  %v451_v37 = vld [vmem:[#allocation8 + $0x508] sm:$0xff] }
  0x4b   :  { %405 = vmatpush.msra.mxu0 %v159_v41  ;;  %386 = vmatpush.msrb.mxu3 %v154_v44  ;;  %v452_v38 = vld [vmem:[#allocation8 + $0x510] sm:$0xff]  ;;  %v453_v39 = vld [vmem:[#allocation8 + $0x518] sm:$0xff]  ;;  %v446_v40 = vld [vmem:[#allocation8 + $0x4e0] sm:$0xff] }
  0x4c   :  { %347 = vmatpush.msrb.mxu1 %v148_v46  ;;  %367 = vmatpush.msrb.mxu2 %v149_v47  ;;  %v447_v41 = vld [vmem:[#allocation8 + $0x4e8] sm:$0xff]  ;;  %v448_v42 = vld [vmem:[#allocation8 + $0x4f0] sm:$0xff]  ;;  %v449_v43 = vld [vmem:[#allocation8 + $0x4f8] sm:$0xff] }
  0x4d   :  { %406 = vmatpush.msra.mxu0 %v155_v45  ;;  %387 = vmatpush.msrb.mxu3 %v150_v48  ;;  %v442_v44 = vld [vmem:[#allocation8 + $0x4c0] sm:$0xff]  ;;  %v443_v45 = vld [vmem:[#allocation8 + $0x4c8] sm:$0xff]  ;;  %v444_v46 = vld [vmem:[#allocation8 + $0x4d0] sm:$0xff] }
  0x4e   :  { %348 = vmatpush.msrb.mxu1 %v144_v50  ;;  %368 = vmatpush.msrb.mxu2 %v145_v51  ;;  %v445_v47 = vld [vmem:[#allocation8 + $0x4d8] sm:$0xff]  ;;  %v438_v48 = vld [vmem:[#allocation8 + $0x4a0] sm:$0xff]  ;;  %v440_v50 = vld [vmem:[#allocation8 + $0x4b0] sm:$0xff] }
  0x4f   :  { %407 = vmatpush.msra.mxu0 %v151_v49  ;;  %388 = vmatpush.msrb.mxu3 %v146_v52  ;;  %v439_v49 = vld [vmem:[#allocation8 + $0x4a8] sm:$0xff]  ;;  %v441_v51 = vld [vmem:[#allocation8 + $0x4b8] sm:$0xff]  ;;  %v434_v52 = vld [vmem:[#allocation8 + $0x480] sm:$0xff] }
  0x50   :  { %349 = vmatpush.msrb.mxu1 %v140_v54  ;;  %369 = vmatpush.msrb.mxu2 %v141_v55  ;;  %v436_v54 = vld [vmem:[#allocation8 + $0x490] sm:$0xff]  ;;  %v437_v55 = vld [vmem:[#allocation8 + $0x498] sm:$0xff] }
  0x51   :  { %408 = vmatpush.msra.mxu0 %v147_v53  ;;  %389 = vmatpush.msrb.mxu3 %v142_v56  ;;  %v435_v53 = vld [vmem:[#allocation8 + $0x488] sm:$0xff]  ;;  %v430_v56 = vld [vmem:[#allocation8 + $0x460] sm:$0xff] }
  0x52   :  { %350 = vmatpush.msrb.mxu1 %v136_v58  ;;  %370 = vmatpush.msrb.mxu2 %v137_v59  ;;  %v432_v58 = vld [vmem:[#allocation8 + $0x470] sm:$0xff]  ;;  %v433_v59 = vld [vmem:[#allocation8 + $0x478] sm:$0xff] }
  0x53   :  { %409 = vmatpush.msra.mxu0 %v143_v57  ;;  %390 = vmatpush.msrb.mxu3 %v138_v60  ;;  %v431_v57 = vld [vmem:[#allocation8 + $0x468] sm:$0xff]  ;;  %v426_v60 = vld [vmem:[#allocation8 + $0x440] sm:$0xff] }
  0x54   :  { %351 = vmatpush.msrb.mxu1 %v132_v62  ;;  %371 = vmatpush.msrb.mxu2 %v133_v63  ;;  %v428_v62 = vld [vmem:[#allocation8 + $0x450] sm:$0xff]  ;;  %v429_v63 = vld [vmem:[#allocation8 + $0x458] sm:$0xff] }
  0x55   :  { %410 = vmatpush.msra.mxu0 %v139_v61  ;;  %391 = vmatpush.msrb.mxu3 %v134_v0  ;;  %v427_v61 = vld [vmem:[#allocation8 + $0x448] sm:$0xff]  ;;  %v422_v0 = vld [vmem:[#allocation8 + $0x420] sm:$0xff] }
  0x56   :  { %352 = vmatpush.msrb.mxu1 %v128_v2  ;;  %372 = vmatpush.msrb.mxu2 %v129_v3  ;;  %v424_v2 = vld [vmem:[#allocation8 + $0x430] sm:$0xff]  ;;  %v425_v3 = vld [vmem:[#allocation8 + $0x438] sm:$0xff] }
  0x57   :  { %411 = vmatpush.msra.mxu0 %v135_v1  ;;  %392 = vmatpush.msrb.mxu3 %v130_v4  ;;  %v423_v1 = vld [vmem:[#allocation8 + $0x428] sm:$0xff]  ;;  %v418_v4 = vld [vmem:[#allocation8 + $0x400] sm:$0xff] }
  0x59   :  { %412 = vmatpush.msra.mxu0 %v131_v5  ;;  %v419_v5 = vld [vmem:[#allocation8 + $0x408] sm:$0xff] }
  0x95   :  { %v116_v6 = vpop.f32.mrf.mxu0 }
  0x9d   :  { %v119_v7 = vpop.f32.mrf.mxu0 }
  0x9e   :  { %273 = vmatmul.f32.vlgmr.msra.gmra.mxu1 %v119_v7  ;;  %293 = vmatmul.f32.vlgmr.msra.gmra.mxu2 %v119_v7 }
  0x9f   :  { %313 = vmatmul.f32.vlgmr.msra.gmra.mxu3 %v119_v7  ;;  %333 = vmatmul.f32.vlgmr.msrb.gmra.mxu0 %v119_v7  ;;  %v421_v7 = vld [vmem:[#allocation8 + $0x418] sm:$0xff] }
  0xa0   :  { %482 = vmatpush.msra.mxu1 %v478_v8  ;;  %502 = vmatpush.msra.mxu2 %v479_v9  ;;  %v627_v9 = vld [vmem:[#allocation8 + $0x7e0] sm:$0xff] }
  0xa1   :  { %522 = vmatpush.msra.mxu3 %v480_v10  ;;  %542 = vmatpush.msrb.mxu0 %v481_v11  ;;  %v628_v10 = vld [vmem:[#allocation8 + $0x7e8] sm:$0xff]  ;;  %v629_v11 = vld [vmem:[#allocation8 + $0x7f0] sm:$0xff] }
  0xa2   :  { %483 = vmatpush.msra.mxu1 %v474_v12  ;;  %503 = vmatpush.msra.mxu2 %v475_v13  ;;  %v630_v12 = vld [vmem:[#allocation8 + $0x7f8] sm:$0xff]  ;;  %v623_v13 = vld [vmem:[#allocation8 + $0x7c0] sm:$0xff] }
  0xa3   :  { %523 = vmatpush.msra.mxu3 %v476_v14  ;;  %543 = vmatpush.msrb.mxu0 %v477_v15  ;;  %v624_v14 = vld [vmem:[#allocation8 + $0x7c8] sm:$0xff]  ;;  %v625_v15 = vld [vmem:[#allocation8 + $0x7d0] sm:$0xff] }
  0xa4   :  { %484 = vmatpush.msra.mxu1 %v470_v16  ;;  %504 = vmatpush.msra.mxu2 %v471_v17  ;;  %v626_v16 = vld [vmem:[#allocation8 + $0x7d8] sm:$0xff]  ;;  %v619_v17 = vld [vmem:[#allocation8 + $0x7a0] sm:$0xff] }
  0xa5   :  { %524 = vmatpush.msra.mxu3 %v472_v18  ;;  %544 = vmatpush.msrb.mxu0 %v473_v19  ;;  %v122_v8 = vpop.f32.mrf.mxu0  ;;  %v620_v18 = vld [vmem:[#allocation8 + $0x7a8] sm:$0xff]  ;;  %v621_v19 = vld [vmem:[#allocation8 + $0x7b0] sm:$0xff] }
  0xa6   :  { %485 = vmatpush.msra.mxu1 %v466_v20  ;;  %505 = vmatpush.msra.mxu2 %v467_v21  ;;  %v622_v20 = vld [vmem:[#allocation8 + $0x7b8] sm:$0xff]  ;;  %v615_v21 = vld [vmem:[#allocation8 + $0x780] sm:$0xff] }
  0xa7   :  { %525 = vmatpush.msra.mxu3 %v468_v22  ;;  %545 = vmatpush.msrb.mxu0 %v469_v23  ;;  %v616_v22 = vld [vmem:[#allocation8 + $0x788] sm:$0xff]  ;;  %v617_v23 = vld [vmem:[#allocation8 + $0x790] sm:$0xff] }
  0xa8   :  { %353 = vmatmul.f32.vlgmr.msrb.gmra.mxu1 %v116_v6  ;;  %373 = vmatmul.f32.vlgmr.msrb.gmra.mxu2 %v116_v6 }
  0xa9   :  { %393 = vmatmul.f32.vlgmr.msrb.gmra.mxu3 %v116_v6  ;;  %413 = vmatmul.f32.vlgmr.msra.gmra.mxu0 %v116_v6  ;;  %v420_v6 = vld [vmem:[#allocation8 + $0x410] sm:$0xff] }
  0xaa   :  { %486 = vmatpush.msra.mxu1 %v462_v24  ;;  %506 = vmatpush.msra.mxu2 %v463_v25  ;;  %v618_v24 = vld [vmem:[#allocation8 + $0x798] sm:$0xff]  ;;  %v611_v25 = vld [vmem:[#allocation8 + $0x760] sm:$0xff] }
  0xab   :  { %526 = vmatpush.msra.mxu3 %v464_v26  ;;  %546 = vmatpush.msrb.mxu0 %v465_v27  ;;  %v612_v26 = vld [vmem:[#allocation8 + $0x768] sm:$0xff]  ;;  %v613_v27 = vld [vmem:[#allocation8 + $0x770] sm:$0xff] }
  0xac   :  { %487 = vmatpush.msra.mxu1 %v458_v28  ;;  %507 = vmatpush.msra.mxu2 %v459_v29  ;;  %v614_v28 = vld [vmem:[#allocation8 + $0x778] sm:$0xff]  ;;  %v607_v29 = vld [vmem:[#allocation8 + $0x740] sm:$0xff] }
  0xad   :  { %527 = vmatpush.msra.mxu3 %v460_v30  ;;  %547 = vmatpush.msrb.mxu0 %v461_v31  ;;  %v608_v30 = vld [vmem:[#allocation8 + $0x748] sm:$0xff]  ;;  %v609_v31 = vld [vmem:[#allocation8 + $0x750] sm:$0xff] }
  0xae   :  { %488 = vmatpush.msra.mxu1 %v454_v32  ;;  %508 = vmatpush.msra.mxu2 %v455_v33  ;;  %v610_v32 = vld [vmem:[#allocation8 + $0x758] sm:$0xff]  ;;  %v603_v33 = vld [vmem:[#allocation8 + $0x720] sm:$0xff] }
  0xaf   :  { %528 = vmatpush.msra.mxu3 %v456_v34  ;;  %548 = vmatpush.msrb.mxu0 %v457_v35  ;;  %v604_v34 = vld [vmem:[#allocation8 + $0x728] sm:$0xff]  ;;  %v605_v35 = vld [vmem:[#allocation8 + $0x730] sm:$0xff] }
  0xb0   :  { %489 = vmatpush.msra.mxu1 %v450_v36  ;;  %509 = vmatpush.msra.mxu2 %v451_v37  ;;  %v606_v36 = vld [vmem:[#allocation8 + $0x738] sm:$0xff]  ;;  %v599_v37 = vld [vmem:[#allocation8 + $0x700] sm:$0xff] }
  0xb1   :  { %529 = vmatpush.msra.mxu3 %v452_v38  ;;  %549 = vmatpush.msrb.mxu0 %v453_v39  ;;  %v600_v38 = vld [vmem:[#allocation8 + $0x708] sm:$0xff]  ;;  %v601_v39 = vld [vmem:[#allocation8 + $0x710] sm:$0xff] }
  0xb2   :  { %490 = vmatpush.msra.mxu1 %v446_v40  ;;  %510 = vmatpush.msra.mxu2 %v447_v41  ;;  %v602_v40 = vld [vmem:[#allocation8 + $0x718] sm:$0xff]  ;;  %v595_v41 = vld [vmem:[#allocation8 + $0x6e0] sm:$0xff] }
  0xb3   :  { %530 = vmatpush.msra.mxu3 %v448_v42  ;;  %550 = vmatpush.msrb.mxu0 %v449_v43  ;;  %v596_v42 = vld [vmem:[#allocation8 + $0x6e8] sm:$0xff]  ;;  %v597_v43 = vld [vmem:[#allocation8 + $0x6f0] sm:$0xff] }
  0xb4   :  { %491 = vmatpush.msra.mxu1 %v442_v44  ;;  %511 = vmatpush.msra.mxu2 %v443_v45  ;;  %v598_v44 = vld [vmem:[#allocation8 + $0x6f8] sm:$0xff]  ;;  %v591_v45 = vld [vmem:[#allocation8 + $0x6c0] sm:$0xff] }
  0xb5   :  { %531 = vmatpush.msra.mxu3 %v444_v46  ;;  %551 = vmatpush.msrb.mxu0 %v445_v47  ;;  %v592_v46 = vld [vmem:[#allocation8 + $0x6c8] sm:$0xff]  ;;  %v593_v47 = vld [vmem:[#allocation8 + $0x6d0] sm:$0xff] }
  0xb6   :  { %492 = vmatpush.msra.mxu1 %v438_v48  ;;  %512 = vmatpush.msra.mxu2 %v439_v49  ;;  %v594_v48 = vld [vmem:[#allocation8 + $0x6d8] sm:$0xff]  ;;  %v587_v49 = vld [vmem:[#allocation8 + $0x6a0] sm:$0xff] }
  0xb7   :  { %532 = vmatpush.msra.mxu3 %v440_v50  ;;  %552 = vmatpush.msrb.mxu0 %v441_v51  ;;  %v588_v50 = vld [vmem:[#allocation8 + $0x6a8] sm:$0xff]  ;;  %v589_v51 = vld [vmem:[#allocation8 + $0x6b0] sm:$0xff] }
  0xb8   :  { %493 = vmatpush.msra.mxu1 %v434_v52  ;;  %513 = vmatpush.msra.mxu2 %v435_v53  ;;  %v590_v52 = vld [vmem:[#allocation8 + $0x6b8] sm:$0xff]  ;;  %v583_v53 = vld [vmem:[#allocation8 + $0x680] sm:$0xff] }
  0xb9   :  { %533 = vmatpush.msra.mxu3 %v436_v54  ;;  %553 = vmatpush.msrb.mxu0 %v437_v55  ;;  %v584_v54 = vld [vmem:[#allocation8 + $0x688] sm:$0xff]  ;;  %v585_v55 = vld [vmem:[#allocation8 + $0x690] sm:$0xff] }
  0xba   :  { %494 = vmatpush.msra.mxu1 %v430_v56  ;;  %514 = vmatpush.msra.mxu2 %v431_v57  ;;  %v586_v56 = vld [vmem:[#allocation8 + $0x698] sm:$0xff]  ;;  %v579_v57 = vld [vmem:[#allocation8 + $0x660] sm:$0xff] }
  0xbb   :  { %534 = vmatpush.msra.mxu3 %v432_v58  ;;  %554 = vmatpush.msrb.mxu0 %v433_v59  ;;  %v580_v58 = vld [vmem:[#allocation8 + $0x668] sm:$0xff]  ;;  %v581_v59 = vld [vmem:[#allocation8 + $0x670] sm:$0xff] }
  0xbc   :  { %495 = vmatpush.msra.mxu1 %v426_v60  ;;  %515 = vmatpush.msra.mxu2 %v427_v61  ;;  %v582_v60 = vld [vmem:[#allocation8 + $0x678] sm:$0xff]  ;;  %v575_v61 = vld [vmem:[#allocation8 + $0x640] sm:$0xff] }
  0xbd   :  { %535 = vmatpush.msra.mxu3 %v428_v62  ;;  %555 = vmatpush.msrb.mxu0 %v429_v63  ;;  %v576_v62 = vld [vmem:[#allocation8 + $0x648] sm:$0xff]  ;;  %v577_v63 = vld [vmem:[#allocation8 + $0x650] sm:$0xff] }
  0xbe   :  { %496 = vmatpush.msra.mxu1 %v422_v0  ;;  %516 = vmatpush.msra.mxu2 %v423_v1  ;;  %v578_v0 = vld [vmem:[#allocation8 + $0x658] sm:$0xff]  ;;  %v571_v1 = vld [vmem:[#allocation8 + $0x620] sm:$0xff] }
  0xbf   :  { %536 = vmatpush.msra.mxu3 %v424_v2  ;;  %556 = vmatpush.msrb.mxu0 %v425_v3  ;;  %v572_v2 = vld [vmem:[#allocation8 + $0x628] sm:$0xff]  ;;  %v573_v3 = vld [vmem:[#allocation8 + $0x630] sm:$0xff] }
  0xc0   :  { %497 = vmatpush.msra.mxu1 %v418_v4  ;;  %517 = vmatpush.msra.mxu2 %v419_v5  ;;  %v574_v4 = vld [vmem:[#allocation8 + $0x638] sm:$0xff]  ;;  %v567_v5 = vld [vmem:[#allocation8 + $0x600] sm:$0xff] }
  0xc1   :  { %537 = vmatpush.msra.mxu3 %v420_v6  ;;  %557 = vmatpush.msrb.mxu0 %v421_v7  ;;  %v568_v6 = vld [vmem:[#allocation8 + $0x608] sm:$0xff]  ;;  %v569_v7 = vld [vmem:[#allocation8 + $0x610] sm:$0xff] }
  0xc2   :  { %498 = vmatmul.f32.vlgmr.msra.gmra.mxu1 %v122_v8  ;;  %518 = vmatmul.f32.vlgmr.msra.gmra.mxu2 %v122_v8 }
  0xc3   :  { %538 = vmatmul.f32.vlgmr.msra.gmra.mxu3 %v122_v8  ;;  %558 = vmatmul.f32.vlgmr.msrb.gmra.mxu0 %v122_v8  ;;  %v570_v8 = vld [vmem:[#allocation8 + $0x618] sm:$0xff] }
  0xc4   :  { %631 = vmatpush.msrb.mxu1 %v627_v9  ;;  %651 = vmatpush.msrb.mxu2 %v628_v10  ;;  %v125_v9 = vpop.f32.mrf.mxu0  ;;  %v81_v10 = vld [vmem:[#allocation7] sm:$0xff] }
  0xc5   :  { %671 = vmatpush.msrb.mxu3 %v629_v11  ;;  %691 = vmatpush.msra.mxu0 %v630_v12 }
  0xc6   :  { %632 = vmatpush.msrb.mxu1 %v623_v13  ;;  %652 = vmatpush.msrb.mxu2 %v624_v14 }
  0xc7   :  { %672 = vmatpush.msrb.mxu3 %v625_v15  ;;  %692 = vmatpush.msra.mxu0 %v626_v16 }
  0xc8   :  { %633 = vmatpush.msrb.mxu1 %v619_v17  ;;  %653 = vmatpush.msrb.mxu2 %v620_v18 }
  0xc9   :  { %673 = vmatpush.msrb.mxu3 %v621_v19  ;;  %693 = vmatpush.msra.mxu0 %v622_v20 }
  0xca   :  { %634 = vmatpush.msrb.mxu1 %v615_v21  ;;  %654 = vmatpush.msrb.mxu2 %v616_v22 }
  0xcb   :  { %674 = vmatpush.msrb.mxu3 %v617_v23  ;;  %694 = vmatpush.msra.mxu0 %v618_v24 }
  0xcc   :  { %635 = vmatpush.msrb.mxu1 %v611_v25  ;;  %655 = vmatpush.msrb.mxu2 %v612_v26 }
  0xcd   :  { %675 = vmatpush.msrb.mxu3 %v613_v27  ;;  %695 = vmatpush.msra.mxu0 %v614_v28 }
  0xce   :  { %636 = vmatpush.msrb.mxu1 %v607_v29  ;;  %656 = vmatpush.msrb.mxu2 %v608_v30 }
  0xcf   :  { %676 = vmatpush.msrb.mxu3 %v609_v31  ;;  %696 = vmatpush.msra.mxu0 %v610_v32 }
  0xd0   :  { %637 = vmatpush.msrb.mxu1 %v603_v33  ;;  %657 = vmatpush.msrb.mxu2 %v604_v34 }
  0xd1   :  { %677 = vmatpush.msrb.mxu3 %v605_v35  ;;  %697 = vmatpush.msra.mxu0 %v606_v36 }
  0xd2   :  { %638 = vmatpush.msrb.mxu1 %v599_v37  ;;  %658 = vmatpush.msrb.mxu2 %v600_v38 }
  0xd3   :  { %678 = vmatpush.msrb.mxu3 %v601_v39  ;;  %698 = vmatpush.msra.mxu0 %v602_v40 }
  0xd4   :  { %639 = vmatpush.msrb.mxu1 %v595_v41  ;;  %659 = vmatpush.msrb.mxu2 %v596_v42 }
  0xd5   :  { %679 = vmatpush.msrb.mxu3 %v597_v43  ;;  %699 = vmatpush.msra.mxu0 %v598_v44 }
  0xd6   :  { %640 = vmatpush.msrb.mxu1 %v591_v45  ;;  %660 = vmatpush.msrb.mxu2 %v592_v46 }
  0xd7   :  { %680 = vmatpush.msrb.mxu3 %v593_v47  ;;  %700 = vmatpush.msra.mxu0 %v594_v48 }
  0xd8   :  { %641 = vmatpush.msrb.mxu1 %v587_v49  ;;  %661 = vmatpush.msrb.mxu2 %v588_v50 }
  0xd9   :  { %681 = vmatpush.msrb.mxu3 %v589_v51  ;;  %701 = vmatpush.msra.mxu0 %v590_v52 }
  0xda   :  { %642 = vmatpush.msrb.mxu1 %v583_v53  ;;  %662 = vmatpush.msrb.mxu2 %v584_v54 }
  0xdb   :  { %682 = vmatpush.msrb.mxu3 %v585_v55  ;;  %702 = vmatpush.msra.mxu0 %v586_v56 }
  0xdc   :  { %643 = vmatpush.msrb.mxu1 %v579_v57  ;;  %663 = vmatpush.msrb.mxu2 %v580_v58 }
  0xdd   :  { %683 = vmatpush.msrb.mxu3 %v581_v59  ;;  %703 = vmatpush.msra.mxu0 %v582_v60 }
  0xde   :  { %644 = vmatpush.msrb.mxu1 %v575_v61  ;;  %664 = vmatpush.msrb.mxu2 %v576_v62 }
  0xdf   :  { %684 = vmatpush.msrb.mxu3 %v577_v63  ;;  %704 = vmatpush.msra.mxu0 %v578_v0 }
  0xe0   :  { %645 = vmatpush.msrb.mxu1 %v571_v1  ;;  %665 = vmatpush.msrb.mxu2 %v572_v2 }
  0xe1   :  { %685 = vmatpush.msrb.mxu3 %v573_v3  ;;  %705 = vmatpush.msra.mxu0 %v574_v4 }
  0xe2   :  { %646 = vmatpush.msrb.mxu1 %v567_v5  ;;  %666 = vmatpush.msrb.mxu2 %v568_v6 }
  0xe3   :  { %686 = vmatpush.msrb.mxu3 %v569_v7  ;;  %706 = vmatpush.msra.mxu0 %v570_v8 }
  0xe4   :  { %647 = vmatmul.f32.vlgmr.msrb.gmra.mxu1 %v125_v9  ;;  %667 = vmatmul.f32.vlgmr.msrb.gmra.mxu2 %v125_v9 }
  0xe5   :  { %687 = vmatmul.f32.vlgmr.msrb.gmra.mxu3 %v125_v9  ;;  %707 = vmatmul.f32.vlgmr.msra.gmra.mxu0 %v125_v9 }
  0xe6   :  { %758 = vmatpush.msra.mxu2 %v81_v10  ;;  %783 = vmatpush.msra.mxu3 %v81_v10 }
  0xe7   :  { %734 = vmatpush.msra.mxu1 %v81_v10  ;;  %808 = vmatpush.msrb.mxu0 %v81_v10 }
 0x11b   :  { %v274_v11 = vpop.f32.mrf.mxu1 }
 0x11c   :  { %v334_v12 = vpop.f32.mrf.mxu0 }
 0x121   :  { %v294_v13 = vpop.f32.mrf.mxu2 }
 0x122   :  { %v314_v14 = vpop.f32.mrf.mxu3 }
 0x125   :  { %v354_v15 = vpop.f32.mrf.mxu1 }
 0x126   :  { %v414_v16 = vpop.f32.mrf.mxu0  ;;  %v355_v21 = vadd.f32 %v354_v15, %v274_v11 }
 0x127   :  { %v415_v22 = vadd.f32 %v414_v16, %v334_v12 }
 0x12b   :  { %v374_v17 = vpop.f32.mrf.mxu2 }
 0x12c   :  { %v394_v18 = vpop.f32.mrf.mxu3  ;;  %v375_v31 = vadd.f32 %v374_v17, %v294_v13 }
 0x12d   :  { %v395_v32 = vadd.f32 %v394_v18, %v314_v14 }
 0x13f   :  { %v499_v19 = vpop.f32.mrf.mxu1 }
 0x140   :  { %v559_v20 = vpop.f32.mrf.mxu0  ;;  %v562_v24 = vadd.f32 %v499_v19, %v355_v21 }
 0x141   :  { %v565_v26 = vadd.f32 %v559_v20, %v415_v22 }
 0x145   :  { %v519_v23 = vpop.f32.mrf.mxu2 }
 0x146   :  { %v539_v25 = vpop.f32.mrf.mxu3  ;;  %v563_v33 = vadd.f32 %v519_v23, %v375_v31 }
 0x147   :  { %v564_v34 = vadd.f32 %v539_v25, %v395_v32 }
 0x161   :  { %v648_v27 = vpop.f32.mrf.mxu1 }
 0x162   :  { %v711_v28 = vadd.f32 %v648_v27, %v562_v24  ;;  %v708_v29 = vpop.f32.mrf.mxu0 }
 0x163   :  { %v714_v30 = vadd.f32 %v708_v29, %v565_v26 }
 0x164   :  { %840 = vmatmul.msk.f32.vlgmr.msra.gmra.mxu1 %vm715_vm1, %v711_v28 }
 0x165   :  { %843 = vmatmul.msk.f32.vlgmr.msrb.gmra.mxu0 %vm715_vm1, %v714_v30 }
 0x167   :  { %v668_v35 = vpop.f32.mrf.mxu2 }
 0x168   :  { %v712_v36 = vadd.f32 %v668_v35, %v563_v33  ;;  %v688_v37 = vpop.f32.mrf.mxu3 }
 0x169   :  { %v713_v38 = vadd.f32 %v688_v37, %v564_v34 }
 0x16a   :  { %841 = vmatmul.msk.f32.vlgmr.msra.gmra.mxu2 %vm715_vm1, %v712_v36 }
 0x16b   :  { %842 = vmatmul.msk.f32.vlgmr.msra.gmra.mxu3 %vm715_vm1, %v713_v38 }
 0x1e1   :  { %v736_v39 = vpop.f32.mrf.mxu1 }
 0x1e2   :  { %739 = vst.msk [vmem:[#allocation10] sm:$0xff] %vm86_vm0, %v736_v39  ;;  %v810_v40 = vpop.f32.mrf.mxu0 }
 0x1e3   :  { %814 = vst.msk [vmem:[#allocation10 + $0x18] sm:$0xff] %vm86_vm0, %v810_v40 }
 0x1ed   :  { %v760_v41 = vpop.f32.mrf.mxu2 }
 0x1ee   :  { %764 = vst.msk [vmem:[#allocation10 + $0x8] sm:$0xff] %vm86_vm0, %v760_v41  ;;  %v785_v42 = vpop.f32.mrf.mxu3 }
 0x1ef   :  { %789 = vst.msk [vmem:[#allocation10 + $0x10] sm:$0xff] %vm86_vm0, %v785_v42 }
 0x1f0   :  { %827 = dma.vmem_to_hbm [thread:$0]  %s820_s10, 512, %s822_s13, [#allocation4], %s982_s23, %s982_s23, %s983_s24  }
 0x1f1   :  { %979 = dma.done.wait [#allocation4], 512  }
 0x1f2   :  { %980 = vsyncadd [#allocation4], 4294966784 }
 0x1f3   :  { %832 = vsyncpa [#allocation3], 1 }
 0x1f4   :  { %833 = vsyncpa [#allocation6], 1 }
 0x1f5   :  { %834 = vsyncpa [#allocation9], 1 }
 0x1f6   :  { %835 = vsyncpa [#allocation4], 1 }

</bundles_post_ra>
